<compile_context>
chip_gen: v6e
topology: v6e:2x2x1
jax: 0.10.0
libtpu: 0.0.40
codegen_flags: <defaults>
</compile_context>

<pallas_src>
import functools

import jax
import jax.numpy as jnp
from jax.experimental import pallas as pl
from jax.experimental.pallas import tpu as pltpu

_LANES = 128


def _sublane_multiple(dtype) -> int:
    # Second-to-last block dim must be a multiple of 8 (4-byte), 16 (2-byte),
    # or 32 (1-byte) elements for the given dtype.
    return max(8, 32 // jnp.dtype(dtype).itemsize)


def _ab_kernel(s_ref, t_ref, out_ref, *, margin, total_count, block_rows,
               needs_mask):
    i = pl.program_id(0)

    s = s_ref[...].astype(jnp.float32)
    t = t_ref[...].astype(jnp.float32)
    m = jnp.float32(margin)

    br, lanes = s_ref.shape

    d1 = s + m
    d2 = s - m
    loss = (
        jnp.where((s > -m) & (t <= 0), d1 * d1, 0.0)
        + jnp.where((s <= m) & (t > 0), d2 * d2, 0.0)
    )

    if needs_mask:
        # Flat element index of every lane in this tile -> validity mask for
        # the padded / out-of-bounds tail.  Garbage values read from the
        # boundary block are zeroed by the select (select, not multiply, so
        # NaN/inf garbage is harmless).  Only emitted when the wrapper has
        # determined statically that some tail exists.
        row_idx = (
            jax.lax.broadcasted_iota(jnp.int32, (br, lanes), 0) + i * block_rows
        )
        lane_idx = jax.lax.broadcasted_iota(jnp.int32, (br, lanes), 1)
        valid = row_idx * lanes + lane_idx < total_count
        loss = jnp.where(valid, loss, 0.0)

    # Keep the per-tile partial sum vreg-shaped: reduce (br, 128) over groups
    # of 8 sublanes with pure vreg adds (no XLU cross-lane reduce, no scalar
    # RMW per step).  The single final reduction happens outside the kernel
    # on a tiny (num_blocks, 8, 128) array.
    out_ref[0] = jnp.sum(loss.reshape(br // 8, 8, lanes), axis=0)


def ab_loss(fm_s, fm_t, margin, *, block_rows=4096):
    """Pallas implementation of AB(margin)(fm_s, fm_t). Returns a scalar."""
    assert fm_s.shape == fm_t.shape
    total = fm_s.size

    # Native-dtype flat views: no wrapper-side upcast; the f32 cast happens
    # in-kernel on the VPU.
    s_flat = jnp.ravel(fm_s)
    t_flat = jnp.ravel(fm_t)

    # Only if the element count is not a multiple of 128 do we need a pad so
    # the lane-dense (rows, 128) reshape exists; padded elements are masked
    # out inside the kernel, so the pad value is irrelevant.
    lane_pad = (-total) % _LANES
    if lane_pad:
        s_flat = jnp.pad(s_flat, (0, lane_pad))
        t_flat = jnp.pad(t_flat, (0, lane_pad))
    rows = (total + lane_pad) // _LANES

    sub = max(_sublane_multiple(fm_s.dtype), _sublane_multiple(fm_t.dtype))
    # Block rows: a multiple of the dtype sublane requirement, capped by the
    # requested block size and by the (rounded-up) row count for tiny inputs.
    br = max(sub, min((int(block_rows) // sub) * sub, pl.cdiv(rows, sub) * sub))
    num_blocks = pl.cdiv(rows, br)

    # Masking is needed only if there is a padded lane tail or the last
    # row-block hangs past the real rows.  Decided statically so the aligned
    # fast path emits zero mask work.
    needs_mask = (lane_pad != 0) or (rows % br != 0)

    s2d = s_flat.reshape(rows, _LANES)
    t2d = t_flat.reshape(rows, _LANES)

    kernel = functools.partial(
        _ab_kernel,
        margin=float(margin),
        total_count=total,
        block_rows=br,
        needs_mask=needs_mask,
    )

    partials = pl.pallas_call(
        kernel,
        out_shape=jax.ShapeDtypeStruct((num_blocks, 8, _LANES), jnp.float32),
        grid_spec=pltpu.PrefetchScalarGridSpec(
            num_scalar_prefetch=0,
            grid=(num_blocks,),
            in_specs=[
                pl.BlockSpec((br, _LANES), lambda i: (i, 0)),
                pl.BlockSpec((br, _LANES), lambda i: (i, 0)),
            ],
            out_specs=pl.BlockSpec((1, 8, _LANES), lambda i: (i, 0, 0)),
        ),
        compiler_params=pltpu.CompilerParams(
            dimension_semantics=("parallel",),
            vmem_limit_bytes=48 << 20,
        ),
    )(s2d, t2d)

    # Tiny final reduction (num_blocks * 1024 floats) done by XLA.
    return jnp.sum(partials) / jnp.float32(total)


def ab_loss_ref(fm_s, fm_t, margin):
    """Pure-JAX reference mirroring the PyTorch module."""
    fm_s = fm_s.astype(jnp.float32)
    fm_t = fm_t.astype(jnp.float32)
    m = jnp.float32(margin)
    loss = (fm_s + m) ** 2 * ((fm_s > -m) & (fm_t <= 0)).astype(jnp.float32) + (
        fm_s - m
    ) ** 2 * ((fm_s <= m) & (fm_t > 0)).astype(jnp.float32)
    return jnp.mean(loss)


if __name__ == "__main__":
    key = jax.random.PRNGKey(0)
    k1, k2, k3, k4, k5, k6 = jax.random.split(key, 6)

    # 1) Primary case: small NCHW feature maps, element count a multiple of
    #    128 -> fully aligned path (no padding, no in-kernel mask).
    fm_s = jax.random.normal(k1, (2, 4, 16, 16), dtype=jnp.float32)
    fm_t = jax.random.normal(k2, (2, 4, 16, 16), dtype=jnp.float32)
    margin = 1.0
    loss = jax.block_until_ready(ab_loss(fm_s, fm_t, margin))
    ref = ab_loss_ref(fm_s, fm_t, margin)
    assert jnp.allclose(loss, ref, rtol=1e-5, atol=1e-5), (loss, ref)

    # 2) bf16 inputs, multi-block grid with a ragged last block (rows not a
    #    multiple of the block) -> exercises in-kernel OOB-row masking and the
    #    native-dtype / in-kernel cast path.
    fm_s2 = jax.random.normal(k3, (2, 3, 16, 24), dtype=jnp.bfloat16)
    fm_t2 = jax.random.normal(k4, (2, 3, 16, 24), dtype=jnp.bfloat16)
    loss2 = jax.block_until_ready(ab_loss(fm_s2, fm_t2, 2.0, block_rows=16))
    ref2 = ab_loss_ref(fm_s2, fm_t2, 2.0)
    assert jnp.allclose(loss2, ref2, rtol=1e-5, atol=1e-5), (loss2, ref2)

    # 3) Element count not a multiple of 128 -> exercises the (tiny) lane pad
    #    plus the flat-index validity mask.
    fm_s3 = jax.random.normal(k5, (3, 5, 7, 11), dtype=jnp.float32)
    fm_t3 = jax.random.normal(k6, (3, 5, 7, 11), dtype=jnp.float32)
    loss3 = jax.block_until_ready(ab_loss(fm_s3, fm_t3, 0.5))
    ref3 = ab_loss_ref(fm_s3, fm_t3, 0.5)
    assert jnp.allclose(loss3, ref3, rtol=1e-5, atol=1e-5), (loss3, ref3)

    print("KERNEL_OK")
</pallas_src>

<mosaic_0001>
module attributes {stable_mosaic.version = 11 : i64} {
  func.func @_ab_kernel(%arg0: i32, %arg1: memref<16x128xf32, #tpu.memory_space<vmem>>, %arg2: memref<16x128xf32, #tpu.memory_space<vmem>>, %arg3: memref<1x8x128xf32, #tpu.memory_space<vmem>>) attributes {dimension_semantics = [#tpu.dimension_semantics<parallel>], iteration_bounds = array<i64: 1>, scalar_prefetch = 0 : i64, scratch_operands = 0 : i64, tpu.core_type = #tpu.core_type<tc>, window_params = [{transform_indices = @transform_0, window_bounds = array<i64: 16, 128>}, {transform_indices = @transform_1, window_bounds = array<i64: 16, 128>}, {transform_indices = @transform_2, window_bounds = array<i64: 1, 8, 128>}]} {
    %c0 = arith.constant 0 : index
    %c0_0 = arith.constant 0 : index
    %0 = vector.load %arg1[%c0, %c0_0] : memref<16x128xf32, #tpu.memory_space<vmem>>, vector<16x128xf32>
    %c0_1 = arith.constant 0 : index
    %c0_2 = arith.constant 0 : index
    %1 = vector.load %arg2[%c0_1, %c0_2] : memref<16x128xf32, #tpu.memory_space<vmem>>, vector<16x128xf32>
    %cst = arith.constant 1.000000e+00 : f32
    %2 = vector.broadcast %cst : f32 to vector<16x128xf32>
    %3 = arith.addf %0, %2 : vector<16x128xf32>
    %cst_3 = arith.constant 1.000000e+00 : f32
    %4 = vector.broadcast %cst_3 : f32 to vector<16x128xf32>
    %5 = arith.subf %0, %4 : vector<16x128xf32>
    %cst_4 = arith.constant 0.000000e+00 : f32
    %cst_5 = arith.constant 1.000000e+00 : f32
    %6 = arith.subf %cst_4, %cst_5 : f32
    %7 = vector.broadcast %6 : f32 to vector<16x128xf32>
    %8 = arith.cmpf ogt, %0, %7 : vector<16x128xf32>
    %cst_6 = arith.constant 0.000000e+00 : f32
    %9 = vector.broadcast %cst_6 : f32 to vector<16x128xf32>
    %10 = arith.cmpf ole, %1, %9 : vector<16x128xf32>
    %11 = arith.andi %8, %10 : vector<16x128xi1>
    %12 = arith.mulf %3, %3 : vector<16x128xf32>
    %cst_7 = arith.constant 0.000000e+00 : f32
    %13 = vector.broadcast %cst_7 : f32 to vector<16x128xf32>
    %14 = arith.select %11, %12, %13 : vector<16x128xi1>, vector<16x128xf32>
    %cst_8 = arith.constant 1.000000e+00 : f32
    %15 = vector.broadcast %cst_8 : f32 to vector<16x128xf32>
    %16 = arith.cmpf ole, %0, %15 : vector<16x128xf32>
    %cst_9 = arith.constant 0.000000e+00 : f32
    %17 = vector.broadcast %cst_9 : f32 to vector<16x128xf32>
    %18 = arith.cmpf ogt, %1, %17 : vector<16x128xf32>
    %19 = arith.andi %16, %18 : vector<16x128xi1>
    %20 = arith.mulf %5, %5 : vector<16x128xf32>
    %cst_10 = arith.constant 0.000000e+00 : f32
    %21 = vector.broadcast %cst_10 : f32 to vector<16x128xf32>
    %22 = arith.select %19, %20, %21 : vector<16x128xi1>, vector<16x128xf32>
    %23 = arith.addf %14, %22 : vector<16x128xf32>
    %24 = vector.shape_cast %23 : vector<16x128xf32> to vector<2x8x128xf32>
    %cst_11 = arith.constant dense<0.000000e+00> : vector<8x128xf32>
    %25 = vector.multi_reduction <add>, %24, %cst_11 [0] : vector<2x8x128xf32> to vector<8x128xf32>
    %c0_12 = arith.constant 0 : index
    %c0_13 = arith.constant 0 : index
    %c0_14 = arith.constant 0 : index
    %26 = vector.load %arg3[%c0_12, %c0_13, %c0_14] : memref<1x8x128xf32, #tpu.memory_space<vmem>>, vector<1x8x128xf32>
    %27 = vector.shape_cast %26 : vector<1x8x128xf32> to vector<8x128xf32>
    %28 = vector.shape_cast %25 : vector<8x128xf32> to vector<1x8x128xf32>
    tpu.vector_store %arg3[%c0_12, %c0_13, %c0_14], %28 {strides = array<i32>} : memref<1x8x128xf32, #tpu.memory_space<vmem>>, vector<1x8x128xf32>,
    return
  }
  func.func @transform_0(%arg0: i32) -> (i32, i32) {
    %c0_i32 = arith.constant 0 : i32
    %c0_i32_0 = arith.constant 0 : i32
    return %arg0, %c0_i32 : i32, i32
  }
  func.func @transform_1(%arg0: i32) -> (i32, i32) {
    %c0_i32 = arith.constant 0 : i32
    %c0_i32_0 = arith.constant 0 : i32
    return %arg0, %c0_i32 : i32, i32
  }
  func.func @transform_2(%arg0: i32) -> (i32, i32, i32) {
    %c0_i32 = arith.constant 0 : i32
    %c0_i32_0 = arith.constant 0 : i32
    %c0_i32_1 = arith.constant 0 : i32
    return %arg0, %c0_i32, %c0_i32_0 : i32, i32, i32
  }
}

</mosaic_0001>

<bundles_post_ra>
// kernel: tpu_custom_call.1
= control target key start
LH: loop header
LB: loop body
LE: loop exit
PB: predicated region body
PF: predicated region fallthrough
CT: control target
= control target key end

     0   :  { %7 = vsyncpa [#allocation3], 0  ;;  %s196_s0 = inlined_call_operand.hbm [shape: f32[16,128], index: 0, kind: input, shape index: {}]   ;;  %s197_s1 = inlined_call_operand.hbm [shape: f32[16,128], index: 1, kind: input, shape index: {}]   ;;  %s198_s2 = inlined_call_operand.hbm [shape: f32[1,8,128], index: 2, kind: output, shape index: {}]  }
   0x1   :  { %8 = vsyncpa [#allocation6], 0 }
   0x2   :  { %9 = vsyncpa [#allocation4], 0  ;;  %s161_s9 = smov [#allocation2]  }
   0x3   :  { %s15_s10 = sshll.u32 %s161_s9, 4  ;;  %s16_s10 = int_to_ptr.vmem [resolvable:$true] %s15_s10 }
   0x4   :  { %s103_s11 = scalar_lea.vmem %s16_s10, 256  ;;  %p108_p1 = scmp.lt.s32.totalorder %s16_s10, %s16_s10 }
   0x5   :  { %p104_p0 = scmp.ne.s32.totalorder %s16_s10, %s103_s11  ;;  %p109_p2 = scmp.lt.s32.totalorder %s103_s11, %s103_s11 }
   0x7   :  { %p110_p3 = por %p109_p2, %p108_p1 }
   0x9   :  { %p111_p4 = pnand %p110_p3, %p104_p0 }
   0xb   :  { %114 = shalt.err (!%p111_p4)
}
   0xc   :  { %s162_s12 = smov 128   ;;  %s163_s13 = smov 8  }
   0xd   :  { %21 = dma.hbm_to_vmem [thread:$0]  %s196_s0, 256, %s16_s10, [#allocation3], %s162_s12, %s162_s12, %s163_s13  }
   0xe   :  { %s164_s16 = smov [#allocation5]  }
   0xf   :  { %s27_s17 = sshll.u32 %s164_s16, 4  ;;  %s28_s17 = int_to_ptr.vmem [resolvable:$true] %s27_s17 }
  0x10   :  { %s123_s18 = scalar_lea.vmem %s28_s17, 256  ;;  %p128_p6 = scmp.lt.s32.totalorder %s28_s17, %s28_s17 }
  0x11   :  { %p124_p5 = scmp.ne.s32.totalorder %s28_s17, %s123_s18  ;;  %p129_p7 = scmp.lt.s32.totalorder %s123_s18, %s123_s18 }
  0x13   :  { %p130_p8 = por %p129_p7, %p128_p6 }
  0x15   :  { %p131_p9 = pnand %p130_p8, %p124_p5 }
  0x17   :  { %134 = shalt.err (!%p131_p9)
}
  0x18   :  { %33 = dma.hbm_to_vmem [thread:$0]  %s197_s1, 256, %s28_s17, [#allocation6], %s162_s12, %s162_s12, %s163_s13  }
  0x19   :  { %155 = dma.done.wait [#allocation3], 256  }
  0x1a   :  { %156 = vsyncadd [#allocation3], 4294967040 }
  0x1b   :  { %157 = dma.done.wait [#allocation6], 256  }
  0x1c   :  { %158 = vsyncadd [#allocation6], 4294967040  ;;  %v40_v0 = vld [vmem:[#allocation2] sm:$0xff]  ;;  %v41_v1 = vld [vmem:[#allocation2 + $0x8] sm:$0xff]  ;;  %s165_s0 = smov [#allocation7]  }
  0x1d   :  { %v42_v2 = vld [vmem:[#allocation5] sm:$0xff]  ;;  %v43_v3 = vld [vmem:[#allocation5 + $0x8] sm:$0xff]  ;;  %v44_v4 = vadd.f32 1.0, %v40_v0  ;;  %v45_v5 = vadd.f32 1.0, %v41_v1  ;;  %v88_v6 = vadd.f32 -1.0, %v40_v0  ;;  %v89_v7 = vadd.f32 -1.0, %v41_v1 }
  0x1e   :  { %vm48_vm0 = vcmp.gt.f32.partialorder %v40_v0, -1.0  ;;  %vm49_vm1 = vcmp.gt.f32.partialorder %v41_v1, -1.0  ;;  %vm50_vm2 = vcmp.le.f32.partialorder %v42_v2, 0.0  ;;  %vm51_vm3 = vcmp.le.f32.partialorder %v43_v3, 0.0  ;;  %s78_s1 = sshll.u32 %s165_s0, 4  ;;  %s79_s1 = int_to_ptr.vmem [resolvable:$true] %s78_s1 }
  0x1f   :  { %vm187_vm4 = vmand %vm48_vm0, %vm50_vm2  ;;  %v54_v9 = vmul.f32 %v44_v4, %v44_v4  ;;  %v55_v10 = vmul.f32 %v45_v5, %v45_v5  ;;  %vm58_vm5 = vcmp.le.f32.partialorder %v40_v0, 1.0  ;;  %vm59_vm6 = vcmp.le.f32.partialorder %v41_v1, 1.0  ;;  %s135_s21 = scalar_lea.vmem %s79_s1, 128  ;;  %p140_p11 = scmp.lt.s32.totalorder %s79_s1, %s79_s1 }
  0x20   :  { %vm53_vm7 = vmand %vm49_vm1, %vm51_vm3  ;;  %vm60_vm8 = vcmp.gt.f32.partialorder %v42_v2, 0.0  ;;  %vm61_vm9 = vcmp.gt.f32.partialorder %v43_v3, 0.0  ;;  %v64_v11 = vmul.f32 %v88_v6, %v88_v6  ;;  %v65_v12 = vmul.f32 %v89_v7, %v89_v7  ;;  %p136_p10 = scmp.ne.s32.totalorder %s79_s1, %s135_s21  ;;  %p141_p12 = scmp.lt.s32.totalorder %s135_s21, %s135_s21 }
  0x21   :  { %v56_v13 = vsel %vm187_vm4, %v54_v9, 0.0  ;;  %v57_v14 = vsel %vm53_vm7, %v55_v10, 0.0  ;;  %vm62_vm10 = vmand %vm58_vm5, %vm60_vm8 }
  0x22   :  { %vm63_vm11 = vmand %vm59_vm6, %vm61_vm9  ;;  %v66_v15 = vsel %vm62_vm10, %v64_v11, 0.0  ;;  %p142_p13 = por %p141_p12, %p140_p11 }
  0x23   :  { %v67_v16 = vsel %vm63_vm11, %v65_v12, 0.0  ;;  %v68_v17 = vadd.f32 %v66_v15, %v56_v13 }
  0x24   :  { %v69_v18 = vadd.f32 %v67_v16, %v57_v14  ;;  %p143_p0 = pnand %p142_p13, %p136_p10 }
  0x26   :  { %v70_v19 = vadd.f32 %v69_v18, %v68_v17 }
  0x28   :  { %71 = vst [vmem:[#allocation7] sm:$0xff] %v70_v19 }
  0x29   :  { %146 = shalt.err (!%p143_p0)
}
  0x2a   :  { %81 = dma.vmem_to_hbm [thread:$0]  %s79_s1, 128, %s198_s2, [#allocation4]  }
  0x2b   :  { %159 = dma.done.wait [#allocation4], 128  }
  0x2c   :  { %160 = vsyncadd [#allocation4], 4294967168 }
  0x2d   :  { %85 = vsyncpa [#allocation3], 1 }
  0x2e   :  { %86 = vsyncpa [#allocation6], 1 }
  0x2f   :  { %87 = vsyncpa [#allocation4], 1 }

</bundles_post_ra>
